<compile_context>
chip_gen: v7x
topology: tpu7x:2x2x1
jax: 0.10.0
libtpu: 0.0.40
codegen_flags: <defaults>
</compile_context>

<pallas_src>
import functools

import jax
import jax.numpy as jnp
from jax.experimental import pallas as pl
from jax.experimental.pallas import tpu as pltpu


def _round_up(x, m):
    return ((x + m - 1) // m) * m


def _bpr_tile_kernel(n_valid_ref, u_ref, i_ref, j_ref, o_ref, *, weight_decay):
    # n_valid_ref : SMEM int32 (1,)  -- number of valid (non-padded) rows
    # u_ref/i_ref/j_ref : [bt, dim] VMEM tiles (any float dtype; upcast here)
    # o_ref : [1, 1, 1] f32 VMEM -- this tile's partial loss
    bt = u_ref.shape[0]
    b = pl.program_id(0)

    u = u_ref[...].astype(jnp.float32)
    i = i_ref[...].astype(jnp.float32)
    j = j_ref[...].astype(jnp.float32)

    # Validity mask built in-kernel: global row index < n_valid.
    row = jax.lax.broadcasted_iota(jnp.int32, (bt, 1), 0) + b * bt
    m = (row < n_valid_ref[0]).astype(jnp.float32)              # [bt, 1]

    # Fused row dot: x_uij = sum_d u * (i - j)  (one multiply + one reduce).
    x_uij = jnp.sum(u * (i - j), axis=-1, keepdims=True)        # [bt, 1]

    # Numerically stable logsigmoid(x) = min(x, 0) - log1p(exp(-|x|)).
    log_sig = jnp.minimum(x_uij, 0.0) - jnp.log1p(jnp.exp(-jnp.abs(x_uij)))
    log_prob = jnp.sum(m * log_sig)

    # Single fused L2 reduce; padded rows hold real W[0]/H[0] data -> mask it.
    sq = jnp.sum(u * u + i * i + j * j, axis=-1, keepdims=True)  # [bt, 1]
    reg = weight_decay * jnp.sum(m * sq)

    o_ref[...] = jnp.reshape(reg - log_prob, (1, 1, 1))


def bpr_loss(W, H, u_idx, i_idx, j_idx, weight_decay, block_b=8192):
    """BPR loss: -sum(logsigmoid(<W_u, H_i> - <W_u, H_j>)) + wd * L2."""
    dim = W.shape[1]
    itemsize = jnp.dtype(W.dtype).itemsize
    B = int(u_idx.shape[0])

    # Batch tile (batch maps to the sublane axis, dim to lanes).
    # VMEM budget per row: 3 inputs x 2 pipeline buffers (native dtype) plus
    # ~6 live f32 temporaries from the in-kernel upcast / elementwise stages.
    vmem_budget = 32 * 1024 * 1024
    per_row_bytes = dim * (6 * itemsize + 24)
    max_bt = max(8, (vmem_budget // per_row_bytes) // 8 * 8)
    bt = min(int(block_b), max_bt, _round_up(B, 8))
    bt = max(8, (bt // 8) * 8)
    padded_b = _round_up(B, bt)
    n_tiles = padded_b // bt

    # Pad only the tiny index vectors (with index 0); padded rows are masked
    # inside the kernel.
    pad = padded_b - B
    if pad:
        u_idx = jnp.pad(u_idx, (0, pad))
        i_idx = jnp.pad(i_idx, (0, pad))
        j_idx = jnp.pad(j_idx, (0, pad))

    # Row gather straight into the kernel layout [padded_b, dim]; no transpose.
    u_e = jnp.take(W, u_idx, axis=0)
    i_e = jnp.take(H, i_idx, axis=0)
    j_e = jnp.take(H, j_idx, axis=0)

    n_valid = jnp.array([B], dtype=jnp.int32)   # scalar-prefetch (SMEM)

    kernel = functools.partial(_bpr_tile_kernel, weight_decay=float(weight_decay))

    cost = pl.CostEstimate(
        flops=int(10 * padded_b * dim),
        transcendentals=int(2 * padded_b),
        bytes_accessed=int(3 * padded_b * dim * itemsize + 4 * n_tiles + 4),
    )

    # Keep headroom for pipeline buffers + f32 temporaries; stays <= 48 MiB so
    # it is safe on v7x (64 MiB physical) while still exceeding v5e's 16 MiB
    # scoped default.
    vmem_limit = int(min(48 * 1024 * 1024,
                         max(32 * 1024 * 1024, int(per_row_bytes * bt * 1.5))))

    partials = pl.pallas_call(
        kernel,
        out_shape=jax.ShapeDtypeStruct((n_tiles, 1, 1), jnp.float32),
        grid_spec=pltpu.PrefetchScalarGridSpec(
            num_scalar_prefetch=1,
            grid=(n_tiles,),
            in_specs=[
                pl.BlockSpec((bt, dim), lambda b, nv: (b, 0)),
                pl.BlockSpec((bt, dim), lambda b, nv: (b, 0)),
                pl.BlockSpec((bt, dim), lambda b, nv: (b, 0)),
            ],
            out_specs=pl.BlockSpec((1, 1, 1), lambda b, nv: (b, 0, 0)),
        ),
        compiler_params=pltpu.CompilerParams(
            dimension_semantics=("parallel",),   # v7x: both TCs share the grid
            vmem_limit_bytes=vmem_limit,
        ),
        cost_estimate=cost,
    )(n_valid, u_e, i_e, j_e)

    # Per-tile partials -> scalar loss (tiny reduction in plain JAX).
    return jnp.sum(partials)


def _reference_loss(W, H, u_idx, i_idx, j_idx, weight_decay):
    u = W[u_idx].astype(jnp.float32)
    i = H[i_idx].astype(jnp.float32)
    j = H[j_idx].astype(jnp.float32)
    x_uij = jnp.sum(u * i, axis=1) - jnp.sum(u * j, axis=1)
    log_prob = jnp.sum(jax.nn.log_sigmoid(x_uij))
    reg = weight_decay * (jnp.sum(u * u) + jnp.sum(i * i) + jnp.sum(j * j))
    return -log_prob + reg


if __name__ == "__main__":
    # Config (small, synthetic)
    n_user, n_item, dim = 16, 32, 32
    weight_decay = 0.025

    key = jax.random.PRNGKey(0)
    kW, kH, ku, ki, kj, ku2, ki2, kj2, ku3, ki3, kj3 = jax.random.split(key, 11)

    # Deterministic Xavier-normal init (matches nn.init.xavier_normal_ shapes).
    std_W = (2.0 / (n_user + dim)) ** 0.5
    std_H = (2.0 / (n_item + dim)) ** 0.5
    W = jax.random.normal(kW, (n_user, dim), dtype=jnp.float32) * std_W
    H = jax.random.normal(kH, (n_item, dim), dtype=jnp.float32) * std_H

    # Case 1: tiny batch, single tile.
    batch = 8
    u_idx = jax.random.randint(ku, (batch,), 0, n_user, dtype=jnp.int32)
    i_idx = jax.random.randint(ki, (batch,), 0, n_item, dtype=jnp.int32)
    j_idx = jax.random.randint(kj, (batch,), 0, n_item, dtype=jnp.int32)

    loss = bpr_loss(W, H, u_idx, i_idx, j_idx, weight_decay)
    jax.block_until_ready(loss)
    ref = _reference_loss(W, H, u_idx, i_idx, j_idx, weight_decay)
    assert jnp.allclose(loss, ref, rtol=1e-5, atol=1e-5), (loss, ref)

    # Case 2: ragged batch spanning multiple parallel tiles (tests per-tile
    # partials + in-kernel mask with non-zero padded rows).
    batch2 = 300
    u_idx2 = jax.random.randint(ku2, (batch2,), 0, n_user, dtype=jnp.int32)
    i_idx2 = jax.random.randint(ki2, (batch2,), 0, n_item, dtype=jnp.int32)
    j_idx2 = jax.random.randint(kj2, (batch2,), 0, n_item, dtype=jnp.int32)

    loss2 = bpr_loss(W, H, u_idx2, i_idx2, j_idx2, weight_decay, block_b=128)
    jax.block_until_ready(loss2)
    ref2 = _reference_loss(W, H, u_idx2, i_idx2, j_idx2, weight_decay)
    assert jnp.allclose(loss2, ref2, rtol=1e-5, atol=1e-5), (loss2, ref2)

    # Case 3: bf16 embedding tables (half the HBM traffic); kernel upcasts to
    # f32, so it matches the f32 reference run on the bf16-rounded tables.
    W_bf16 = W.astype(jnp.bfloat16)
    H_bf16 = H.astype(jnp.bfloat16)
    batch3 = 1000
    u_idx3 = jax.random.randint(ku3, (batch3,), 0, n_user, dtype=jnp.int32)
    i_idx3 = jax.random.randint(ki3, (batch3,), 0, n_item, dtype=jnp.int32)
    j_idx3 = jax.random.randint(kj3, (batch3,), 0, n_item, dtype=jnp.int32)

    loss3 = bpr_loss(W_bf16, H_bf16, u_idx3, i_idx3, j_idx3, weight_decay)
    jax.block_until_ready(loss3)
    ref3 = _reference_loss(W_bf16, H_bf16, u_idx3, i_idx3, j_idx3, weight_decay)
    assert jnp.allclose(loss3, ref3, rtol=1e-4, atol=1e-4), (loss3, ref3)

    print("KERNEL_OK")
</pallas_src>

<mosaic_0001>
module attributes {stable_mosaic.version = 11 : i64} {
  func.func @_bpr_tile_kernel(%arg0: i32, %arg1: memref<1xi32, #tpu.memory_space<smem>>, %arg2: memref<8x32xf32, #tpu.memory_space<vmem>>, %arg3: memref<8x32xf32, #tpu.memory_space<vmem>>, %arg4: memref<8x32xf32, #tpu.memory_space<vmem>>, %arg5: memref<1x1x1xf32, #tpu.memory_space<vmem>>) attributes {dimension_semantics = [#tpu.dimension_semantics<parallel>], iteration_bounds = array<i64: 1>, scalar_prefetch = 1 : i64, scratch_operands = 0 : i64, tpu.core_type = #tpu.core_type<tc>, window_params = [{transform_indices = @transform_0, window_bounds = array<i64: 8, 32>}, {transform_indices = @transform_1, window_bounds = array<i64: 8, 32>}, {transform_indices = @transform_2, window_bounds = array<i64: 8, 32>}, {transform_indices = @transform_3, window_bounds = array<i64: 1, 1, 1>}]} {
    %c0 = arith.constant 0 : index
    %c0_0 = arith.constant 0 : index
    %0 = vector.load %arg2[%c0, %c0_0] : memref<8x32xf32, #tpu.memory_space<vmem>>, vector<8x32xf32>
    %c0_1 = arith.constant 0 : index
    %c0_2 = arith.constant 0 : index
    %1 = vector.load %arg3[%c0_1, %c0_2] : memref<8x32xf32, #tpu.memory_space<vmem>>, vector<8x32xf32>
    %c0_3 = arith.constant 0 : index
    %c0_4 = arith.constant 0 : index
    %2 = vector.load %arg4[%c0_3, %c0_4] : memref<8x32xf32, #tpu.memory_space<vmem>>, vector<8x32xf32>
    %3 = tpu.iota {dimensions = array<i32: 0>} : vector<8x1xi32>
    %c8_i32 = arith.constant 8 : i32
    %4 = arith.muli %arg0, %c8_i32 : i32
    %5 = vector.broadcast %4 : i32 to vector<8x1xi32>
    %6 = arith.addi %3, %5 : vector<8x1xi32>
    %c0_5 = arith.constant 0 : index
    %7 = memref.load %arg1[%c0_5] : memref<1xi32, #tpu.memory_space<smem>>
    %8 = vector.broadcast %7 : i32 to vector<8x1xi32>
    %9 = arith.cmpi slt, %6, %8 : vector<8x1xi32>
    %10 = arith.extui %9 : vector<8x1xi1> to vector<8x1xi32>
    %11 = arith.sitofp %10 : vector<8x1xi32> to vector<8x1xf32>
    %12 = arith.subf %1, %2 : vector<8x32xf32>
    %13 = arith.mulf %0, %12 : vector<8x32xf32>
    %cst = arith.constant dense<0.000000e+00> : vector<8xf32>
    %14 = vector.multi_reduction <add>, %13, %cst [1] : vector<8x32xf32> to vector<8xf32>
    %15 = vector.shape_cast %14 : vector<8xf32> to vector<8x1xf32>
    %cst_6 = arith.constant 0.000000e+00 : f32
    %16 = vector.broadcast %cst_6 : f32 to vector<8x1xf32>
    %17 = arith.minimumf %15, %16 : vector<8x1xf32>
    %18 = math.absf %15 : vector<8x1xf32>
    %cst_7 = arith.constant 0.000000e+00 : f32
    %19 = vector.broadcast %cst_7 : f32 to vector<8x1xf32>
    %20 = arith.subf %19, %18 : vector<8x1xf32>
    %21 = math.exp %20 : vector<8x1xf32>
    %22 = math.log1p %21 : vector<8x1xf32>
    %23 = arith.subf %17, %22 : vector<8x1xf32>
    %24 = arith.mulf %11, %23 : vector<8x1xf32>
    %25 = vector.shape_cast %24 : vector<8x1xf32> to vector<1x8x1xf32>
    %cst_8 = arith.constant dense<0.000000e+00> : vector<1xf32>
    %26 = vector.multi_reduction <add>, %25, %cst_8 [1, 2] : vector<1x8x1xf32> to vector<1xf32>
    %27 = vector.shape_cast %26 : vector<1xf32> to vector<1x1x1xf32>
    %28 = vector.extract %27[0, 0, 0] : f32 from vector<1x1x1xf32>
    %29 = arith.mulf %0, %0 : vector<8x32xf32>
    %30 = arith.mulf %1, %1 : vector<8x32xf32>
    %31 = arith.addf %29, %30 : vector<8x32xf32>
    %32 = arith.mulf %2, %2 : vector<8x32xf32>
    %33 = arith.addf %31, %32 : vector<8x32xf32>
    %cst_9 = arith.constant dense<0.000000e+00> : vector<8xf32>
    %34 = vector.multi_reduction <add>, %33, %cst_9 [1] : vector<8x32xf32> to vector<8xf32>
    %35 = vector.shape_cast %34 : vector<8xf32> to vector<8x1xf32>
    %36 = arith.mulf %11, %35 : vector<8x1xf32>
    %37 = vector.shape_cast %36 : vector<8x1xf32> to vector<1x8x1xf32>
    %cst_10 = arith.constant dense<0.000000e+00> : vector<1xf32>
    %38 = vector.multi_reduction <add>, %37, %cst_10 [1, 2] : vector<1x8x1xf32> to vector<1xf32>
    %39 = vector.shape_cast %38 : vector<1xf32> to vector<1x1x1xf32>
    %40 = vector.extract %39[0, 0, 0] : f32 from vector<1x1x1xf32>
    %cst_11 = arith.constant 2.500000e-02 : f32
    %41 = arith.mulf %cst_11, %40 : f32
    %42 = arith.subf %41, %28 : f32
    %43 = vector.broadcast %42 : f32 to vector<1x1x1xf32>
    %c0_12 = arith.constant 0 : index
    %c0_13 = arith.constant 0 : index
    %c0_14 = arith.constant 0 : index
    %44 = vector.load %arg5[%c0_12, %c0_13, %c0_14] : memref<1x1x1xf32, #tpu.memory_space<vmem>>, vector<1x1x1xf32>
    tpu.vector_store %arg5[%c0_12, %c0_13, %c0_14], %43 {strides = array<i32>} : memref<1x1x1xf32, #tpu.memory_space<vmem>>, vector<1x1x1xf32>,
    return
  }
  func.func @transform_0(%arg0: i32, %arg1: memref<1xi32, #tpu.memory_space<smem>>) -> (i32, i32) {
    %c0_i32 = arith.constant 0 : i32
    %c0_i32_0 = arith.constant 0 : i32
    return %arg0, %c0_i32 : i32, i32
  }
  func.func @transform_1(%arg0: i32, %arg1: memref<1xi32, #tpu.memory_space<smem>>) -> (i32, i32) {
    %c0_i32 = arith.constant 0 : i32
    %c0_i32_0 = arith.constant 0 : i32
    return %arg0, %c0_i32 : i32, i32
  }
  func.func @transform_2(%arg0: i32, %arg1: memref<1xi32, #tpu.memory_space<smem>>) -> (i32, i32) {
    %c0_i32 = arith.constant 0 : i32
    %c0_i32_0 = arith.constant 0 : i32
    return %arg0, %c0_i32 : i32, i32
  }
  func.func @transform_3(%arg0: i32, %arg1: memref<1xi32, #tpu.memory_space<smem>>) -> (i32, i32, i32) {
    %c0_i32 = arith.constant 0 : i32
    %c0_i32_0 = arith.constant 0 : i32
    %c0_i32_1 = arith.constant 0 : i32
    return %arg0, %c0_i32, %c0_i32_0 : i32, i32, i32
  }
}

</mosaic_0001>

<bundles_post_ra>
// kernel: tpu_custom_call.1
= control target key start
LH: loop header
LB: loop body
LE: loop exit
PB: predicated region body
PF: predicated region fallthrough
CT: control target
= control target key end

     0   :  { %10 = vsyncpa [#allocation5], 0  ;;  %s283_s0 = inlined_call_operand.<no memory space> [shape: s32[1], index: 0, kind: input, shape index: {}]   ;;  %s284_s1 = inlined_call_operand.hbm [shape: f32[8,32], index: 1, kind: input, shape index: {}]   ;;  %s285_s2 = inlined_call_operand.hbm [shape: f32[8,32], index: 2, kind: input, shape index: {}]   ;;  %s286_s3 = inlined_call_operand.vmem [shape: f32[8,32], index: 3, kind: input, shape index: {}]   ;;  %s287_s4 = inlined_call_operand.hbm [shape: f32[1,1,1], index: 4, kind: output, shape index: {}]  }
   0x1   :  { %11 = vsyncpa [#allocation8], 0 }
   0x2   :  { %12 = vsyncpa [#allocation6], 0  ;;  %s212_s15 = smov [#allocation4]   ;;  %s213_s17 = smov [#allocation7]  }
   0x3   :  { %s19_s16 = sshll.u32 %s212_s15, 4  ;;  %s29_s18 = sshll.u32 %s213_s17, 4  ;;  %s20_s16 = int_to_ptr.vmem [resolvable:$true] %s19_s16  ;;  %s30_s18 = int_to_ptr.vmem [resolvable:$true] %s29_s18 }
   0x4   :  { %s140_s21 = scalar_lea.hbm %s284_s1, 128 }
   0x5   :  { %p141_p0 = scmp.ne.s32.totalorder %s284_s1, %s140_s21  ;;  %p144_p1 = scmp.lt.u32.totalorder %s140_s21, %s284_s1 }
   0x7   :  { %p146_p2 = pnand %p144_p1, %p141_p0 }
   0x9   :  { %149 = shalt.err (!%p146_p2)
}
   0xa   :  { %s150_s26 = scalar_lea.vmem %s20_s16, 128  ;;  %p155_p4 = scmp.lt.s32.totalorder %s20_s16, %s20_s16 }
   0xb   :  { %p151_p3 = scmp.ne.s32.totalorder %s20_s16, %s150_s26  ;;  %p156_p5 = scmp.lt.s32.totalorder %s150_s26, %s150_s26 }
   0xd   :  { %p157_p6 = por %p156_p5, %p155_p4 }
   0xf   :  { %p158_p7 = pnand %p157_p6, %p151_p3 }
  0x11   :  { %161 = shalt.err (!%p158_p7)
}
  0x12   :  { %22 = dma.hbm_to_vmem [thread:$0]  %s284_s1, 128, %s20_s16, [#allocation5]  }
  0x13   :  { %s162_s5 = scalar_lea.hbm %s285_s2, 128 }
  0x14   :  { %p163_p8 = scmp.ne.s32.totalorder %s285_s2, %s162_s5  ;;  %p166_p9 = scmp.lt.u32.totalorder %s162_s5, %s285_s2 }
  0x16   :  { %p168_p10 = pnand %p166_p9, %p163_p8 }
  0x18   :  { %171 = shalt.err (!%p168_p10)
}
  0x19   :  { %s172_s10 = scalar_lea.vmem %s30_s18, 128  ;;  %p177_p12 = scmp.lt.s32.totalorder %s30_s18, %s30_s18 }
  0x1a   :  { %p173_p11 = scmp.ne.s32.totalorder %s30_s18, %s172_s10  ;;  %p178_p13 = scmp.lt.s32.totalorder %s172_s10, %s172_s10 }
  0x1c   :  { %p179_p0 = por %p178_p13, %p177_p12 }
  0x1e   :  { %p180_p1 = pnand %p179_p0, %p173_p11 }
  0x20   :  { %183 = shalt.err (!%p180_p1)
}
  0x21   :  { %32 = dma.hbm_to_vmem [thread:$0]  %s285_s2, 128, %s30_s18, [#allocation8]  }
  0x22   :  { %206 = dma.done.wait [#allocation5], 128  }
  0x23   :  { %207 = vsyncadd [#allocation5], 4294967168 }
  0x24   :  { %208 = dma.done.wait [#allocation8], 128  }
  0x25   :  { %209 = vsyncadd [#allocation8], 4294967168  ;;  %v41_v0 = vld [vmem:[#allocation4] sm:$0xff]  ;;  %v42_v1 = vld [vmem:[#allocation7] sm:$0xff]  ;;  %vm56_vm0 = vcmask 261120   ;;  %v44_v18 = vlaneseq  ;;  %v50_v21 = vstv %s283_s0  ;;  %v214_v28 = vmov 0.0  }
  0x26   :  { %v43_v2 = vld [vmem:[%s286_s3] sm:$0xff]  ;;  %v87_v4 = vmul.f32 %v41_v0, %v41_v0  ;;  %v88_v5 = vmul.f32 %v42_v1, %v42_v1  ;;  %vm76_vm3 = vcmask 7168   ;;  %s215_s16 = smov [#allocation9]   ;;  %vm109_vm4 = vcmask 0  }
  0x27   :  { %v54_v3 = vsub.f32 %v42_v1, %v43_v2  ;;  %v90_v6 = vmul.f32 %v43_v2, %v43_v2  ;;  %v45_v20 = vshrl.u32 %v44_v18, 7  ;;  %s117_s17 = sshll.u32 %s215_s16, 4  ;;  %s118_s17 = int_to_ptr.vmem [resolvable:$true] %s117_s17 }
  0x28   :  { %v89_v8 = vadd.f32 %v88_v5, %v87_v4  ;;  %s184_s19 = scalar_lea.vmem %s118_s17, 16  ;;  %s188_s20 = scalar_lea.vmem %s118_s17, 32 }
  0x29   :  { %v55_v7 = vmul.f32 %v54_v3, %v41_v0  ;;  %vm51_vm1 = vcmp.lt.s32.totalorder %v45_v20, %v50_v21  ;;  %p185_p2 = scmp.ne.s32.totalorder %s118_s17, %s184_s19  ;;  %p189_p3 = scmp.lt.s32.totalorder %s118_s17, %s118_s17 }
  0x2a   :  { %v91_v10 = vadd.f32 %v90_v6, %v89_v8  ;;  %v127_v29 = vsel %vm51_vm1, 1.0, %v214_v28  ;;  %p190_p4 = scmp.lt.s32.totalorder %s188_s20, %s184_s19 }
  0x2b   :  { %v57_v9 = vsel %vm56_vm0, %v55_v7, 0.0 }
  0x2c   :  { %58 = vadd.xlane.f32.xlu0 %v57_v9  ;;  %v92_v11 = vsel %vm56_vm0, %v91_v10, 0.0  ;;  %p191_p5 = por %p190_p4, %p189_p3 }
  0x2e   :  { %p192_p6 = pnand %p191_p5, %p185_p2 }
  0x30   :  { %93 = vadd.xlane.f32.xlu0 %v92_v11 }
  0xb9   :  { %v59_v12 = vpop.xlane.xlu0 %58 }
  0xba   :  { %v61_v13 = vand.u32 2147483647, %v59_v12  ;;  %v60_v27 = vmin.f32 %v59_v12, 0.0 }
  0xbc   :  { %v62_v14 = vsub.f32 0.0, %v61_v13 }
  0xbd   :  { %v94_v31 = vpop.xlane.xlu0 %93 }
  0xbe   :  { %v63_v15 = vmul.f32 1.442695, %v62_v14  ;;  %v95_v34 = vmul.f32 %v127_v29, %v94_v31 }
  0xc0   :  { %136 = vpow2.f32 %v63_v15  ;;  %v96_v36 = vsel %vm76_vm3, %v95_v34, 0.0 }
  0xca   :  { %v137_v16 = vpop.eup %136 }
  0xcb   :  { %v65_v17 = vadd.f32 1.0, %v137_v16  ;;  %v68_v19 = vmul.f32 -0.5, %v137_v16  ;;  %v71_v23 = vand.u32 2147483647, %v137_v16 }
  0xcd   :  { %138 = vlog2.f32 %v65_v17  ;;  %v69_v22 = vadd.f32 1.0, %v68_v19  ;;  %vm72_vm2 = vcmp.lt.f32.partialorder %v71_v23, 0.0004427343 }
  0xcf   :  { %v70_v26 = vmul.f32 %v137_v16, %v69_v22 }
  0xd7   :  { %v139_v24 = vpop.eup %138 }
  0xd8   :  { %v67_v25 = vmul.f32 0.6931472, %v139_v24 }
  0xda   :  { %v73_v30 = vsel %vm72_vm2, %v70_v26, %v67_v25 }
  0xdb   :  { %v74_v32 = vsub.f32 %v60_v27, %v73_v30 }
  0xdd   :  { %v75_v33 = vmul.f32 %v127_v29, %v74_v32 }
  0xdf   :  { %v77_v35 = vsel %vm76_vm3, %v75_v33, 0.0 }
  0xe0   :  { %78 = vadd.xlane.f32.xlu1 %v77_v35 }
  0xe4   :  { %97 = vadd.xlane.f32.xlu1 %v96_v36 }
 0x16d   :  { %v79_v37 = vpop.xlane.xlu1 %78 }
 0x16e   :  { %v80_v38 = vrot.slane %v79_v37, 4 }
 0x170   :  { %v81_v39 = vadd.f32 %v80_v38, %v79_v37 }
 0x171   :  { %v98_v40 = vpop.xlane.xlu1 %97 }
 0x172   :  { %v82_v41 = vrot.slane %v81_v39, 2  ;;  %v99_v42 = vrot.slane %v98_v40, 4 }
 0x174   :  { %v100_v43 = vadd.f32 %v99_v42, %v98_v40  ;;  %v83_v44 = vadd.f32 %v82_v41, %v81_v39 }
 0x176   :  { %v101_v45 = vrot.slane %v100_v43, 2  ;;  %v84_v46 = vrot.slane %v83_v44, 1 }
 0x178   :  { %v102_v47 = vadd.f32 %v101_v45, %v100_v43  ;;  %v85_v48 = vadd.f32 %v84_v46, %v83_v44 }
 0x17a   :  { %128 = vpush %v85_v48  ;;  %v103_v49 = vrot.slane %v102_v47, 1 }
 0x17c   :  { %v104_v50 = vadd.f32 %v103_v49, %v102_v47 }
 0x17e   :  { %130 = vpush %v104_v50 }
 0x1ab   :  { %s129_s0 = spop %128 }
 0x1af   :  { %s131_s14 = spop %130 }
 0x1b0   :  { %s106_s15 = smul.f32 0.025, %s131_s14 }
 0x1b2   :  { %s107_s18 = ssub.f32 %s106_s15, %s129_s0 }
 0x1b4   :  { %v108_v51 = vstv %s107_s18 }
 0x1b5   :  { %110 = vst.msk [vmem:[#allocation9] sm:$0x1] %vm109_vm4, %v108_v51 }
 0x1b6   :  { %195 = shalt.err (!%p192_p6)
}
 0x1b7   :  { %s196_s23 = scalar_lea.hbm %s287_s4, 16 }
 0x1b8   :  { %p197_p7 = scmp.ne.s32.totalorder %s287_s4, %s196_s23  ;;  %p200_p8 = scmp.lt.u32.totalorder %s196_s23, %s287_s4 }
 0x1ba   :  { %p202_p9 = pnand %p200_p8, %p197_p7 }
 0x1bc   :  { %205 = shalt.err (!%p202_p9)
}
 0x1bd   :  { %120 = dma.vmem_to_hbm [thread:$0]  %s118_s17, 16, %s287_s4, [#allocation6]  }
 0x1be   :  { %210 = dma.done.wait [#allocation6], 16  }
 0x1bf   :  { %211 = vsyncadd [#allocation6], 4294967280 }
 0x1c0   :  { %124 = vsyncpa [#allocation5], 1 }
 0x1c1   :  { %125 = vsyncpa [#allocation8], 1 }
 0x1c2   :  { %126 = vsyncpa [#allocation6], 1 }

</bundles_post_ra>
